<compile_context>
chip_gen: v7x
topology: tpu7x:2x2x1
jax: 0.10.0
libtpu: 0.0.40
codegen_flags: <defaults>
</compile_context>

<pallas_src>
import functools

import jax
import jax.numpy as jnp
from jax.experimental import pallas as pl
from jax.experimental.pallas import tpu as pltpu


# ---------------------------------------------------------------------------
# Activation (used both inside the kernel and by the pure-JAX reference)
# ---------------------------------------------------------------------------
def _apply_activation(x, activation, negative_slope):
    if activation is None or activation == "linear":
        return x
    if activation == "leaky_relu":
        # slope < 1  =>  leaky_relu(x) == max(x, slope*x)  (single VPU max)
        return jnp.maximum(x, negative_slope * x)
    if activation == "relu":
        return jnp.maximum(x, 0.0)
    if activation == "elu":
        return jnp.where(x >= 0, x, jnp.expm1(x))
    if activation == "sigmoid":
        return jax.nn.sigmoid(x)
    raise ValueError("Unsupported activation function: {}".format(activation))


# ---------------------------------------------------------------------------
# Kernel: fused KxK conv (pad=K//2, stride=1, no bias) + activation.
#   x_ref     : (1, Cin, 2*HALO + HWp)  one image, NCHW with flattened spatial,
#                                       lane-padded with HALO zeros each side
#   w_ref     : (Cout, K*K*Cin)         taps-major, Cin-minor weight matrix
#   o_ref     : (1, Cout, THW)          one spatial tile of the output
#   patch_ref : (K*K*Cin, THW)          per-tile im2col scratch (VMEM)
# ---------------------------------------------------------------------------
def _conv2d_act_kernel(x_ref, w_ref, o_ref, patch_ref, *,
                       W, Cin, K, THW, HALO, activation, negative_slope):
    r = K // 2
    t = pl.program_id(1)
    Lwin = THW + 2 * HALO

    # Lane-aligned haloed window of the padded image covering this output tile.
    start = pl.multiple_of(t * THW, 128)
    win = x_ref[0, :, pl.ds(start, Lwin)].astype(jnp.float32)       # (Cin, Lwin)

    # Hoisted dx masking: one masked copy of the window per dx != 0, shared by
    # every dy tap.  Masking is in *source* coordinates (column of the source
    # pixel); lanes belonging to the zero padding hold zeros, so their (bogus)
    # column values are harmless.
    shifted = {0: win}
    if r > 0:
        col = (jax.lax.broadcasted_iota(jnp.int32, (1, Lwin), 1)
               + (start - HALO)) % W
        for dx in range(-r, r + 1):
            if dx == 0:
                continue
            keep = (col - dx >= 0) & (col - dx < W)                  # no column wrap
            shifted[dx] = jnp.where(keep, win, 0.0)

    # im2col into the per-tile scratch: K*K statically shifted slices.  The row
    # (dy) zero padding comes from the wrapper's lane pad; the column (dx)
    # padding from the masks above.  Every scratch element is overwritten, so
    # no memset is needed.
    tap = 0
    for dy in range(-r, r + 1):
        for dx in range(-r, r + 1):
            off = HALO + dy * W + dx                                  # static, >= 0
            patch_ref[tap * Cin:(tap + 1) * Cin, :] = shifted[dx][:, off:off + THW]
            tap += 1

    # One fused-K MXU dot for this tile, then the activation epilogue.
    acc = jnp.dot(w_ref[...].astype(jnp.float32), patch_ref[...],
                  preferred_element_type=jnp.float32)                 # (Cout, THW)
    acc = _apply_activation(acc, activation, negative_slope)
    o_ref[0] = acc.astype(o_ref.dtype)


# ---------------------------------------------------------------------------
# Tiling helpers
# ---------------------------------------------------------------------------
def _round_up(a, b):
    return ((a + b - 1) // b) * b


def _pick_spatial_tiling(HW, max_tile_lanes):
    """Return (padded HW, spatial tile).  The tile is a multiple of 128
    (preferring >= 256) that divides the padded HW and is <= max_tile_lanes."""
    HWp = _round_up(HW, 128)
    if HWp <= max_tile_lanes:
        return HWp, HWp
    best = 128
    cand = 256
    while cand <= max_tile_lanes:
        if HWp % cand == 0:
            best = cand
        cand += 128
    return HWp, best


# ---------------------------------------------------------------------------
# Wrapper: NCHW in / NCHW out, matching net_utils.Conv2d.forward semantics
# (default: 3x3, stride 1, padding 1, bias-free conv -> LeakyReLU(0.1)).
# ---------------------------------------------------------------------------
def conv2d_forward(x, weight, stride=1, activation="leaky_relu",
                   negative_slope=0.1, max_tile_lanes=1024):
    N, Cin, H, W = x.shape
    Cout, Cin_w, KH, KW = weight.shape
    if Cin_w != Cin or KH != KW or KH % 2 != 1:
        raise NotImplementedError("square, odd kernel sizes with matching Cin only")
    K = KH
    r = K // 2
    HW = H * W
    HWp, THW = _pick_spatial_tiling(HW, max_tile_lanes)
    T = HWp // THW
    HALO = _round_up(r * (W + 1), 128) if r > 0 else 0   # lane halo (128-aligned)
    Lpad = HWp + 2 * HALO

    # Cheap lane-dim zero pad realises the conv's row zero padding and the
    # lane-dense spatial tiling; no NHWC transposes, no spatial jnp.pad.
    x2d = x.reshape(N, Cin, HW)
    x2d = jnp.pad(x2d, ((0, 0), (0, 0), (HALO, HALO + (HWp - HW))))
    # taps-major, Cin-minor weight matrix matching the im2col row order.
    w2d = jnp.transpose(weight, (0, 2, 3, 1)).reshape(Cout, K * K * Cin)

    kern = functools.partial(
        _conv2d_act_kernel, W=W, Cin=Cin, K=K, THW=THW, HALO=HALO,
        activation=activation, negative_slope=negative_slope)

    # VMEM footprint estimate: double-buffered input/weight/output blocks +
    # im2col scratch + in-kernel window copies / accumulator, with headroom.
    fsz = 4
    isz = x.dtype.itemsize
    fp = (2 * Cin * Lpad * isz                       # input block (x2 buffers)
          + 2 * Cout * THW * isz                     # output block (x2 buffers)
          + 2 * Cout * K * K * Cin * fsz             # weight block (x2 buffers)
          + K * K * Cin * THW * fsz                  # im2col scratch
          + (2 * r + 2) * Cin * (THW + 2 * HALO) * fsz   # window + masked copies
          + 2 * Cout * THW * fsz)                    # f32 accumulator
    vmem_limit = min(max(int(fp * 1.25) + (2 << 20), 32 << 20), 100 << 20)

    cost = pl.CostEstimate(
        flops=2 * N * Cout * HWp * K * K * Cin,
        transcendentals=0,
        bytes_accessed=(x2d.size * x2d.dtype.itemsize
                        + w2d.size * w2d.dtype.itemsize
                        + N * Cout * HWp * isz))

    out2d = pl.pallas_call(
        kern,
        out_shape=jax.ShapeDtypeStruct((N, Cout, HWp), x.dtype),
        grid=(N, T),
        in_specs=[
            pl.BlockSpec((1, Cin, Lpad), lambda n, t: (n, 0, 0)),
            pl.BlockSpec((Cout, K * K * Cin), lambda n, t: (0, 0)),
        ],
        out_specs=pl.BlockSpec((1, Cout, THW), lambda n, t: (n, 0, t)),
        scratch_shapes=[pltpu.VMEM((K * K * Cin, THW), jnp.float32)],
        compiler_params=pltpu.CompilerParams(
            dimension_semantics=("parallel", "parallel"),
            vmem_limit_bytes=vmem_limit),
        cost_estimate=cost,
    )(x2d, w2d)

    out = out2d[:, :, :HW].reshape(N, Cout, H, W)
    if stride != 1:
        # Same-padding stride-s conv == stride-1 conv subsampled every s pixels.
        out = out[:, :, ::stride, ::stride]
    return out


# ---------------------------------------------------------------------------
# Pure-JAX reference with identical semantics (for the self-check)
# ---------------------------------------------------------------------------
def conv2d_reference(x, weight, stride=1, activation="leaky_relu",
                     negative_slope=0.1):
    pad = weight.shape[-1] // 2
    y = jax.lax.conv_general_dilated(
        x, weight, window_strides=(stride, stride),
        padding=((pad, pad), (pad, pad)),
        dimension_numbers=("NCHW", "OIHW", "NCHW"))
    if activation == "leaky_relu":
        return jnp.where(y >= 0, y, negative_slope * y)
    return _apply_activation(y, activation, negative_slope)


if __name__ == "__main__":
    key = jax.random.PRNGKey(0)

    def kaiming_uniform(k, shape):
        fan_in = shape[1] * shape[2] * shape[3]
        bound = (1.0 / fan_in) ** 0.5  # PyTorch default Conv2d init bound
        return jax.random.uniform(k, shape, jnp.float32, -bound, bound)

    configs = [
        # (N, Cin, Cout, H, W, K, stride)
        (2, 4, 8, 16, 16, 3, 1),    # module-default sizes: single spatial tile
        (1, 3, 16, 32, 32, 3, 1),   # THW == 1024 single-tile path
        (1, 4, 8, 20, 20, 3, 1),    # HW=400 -> padded to 512 (lane-padding path)
        (1, 4, 6, 48, 48, 3, 1),    # HW=2304 -> multi-tile path (THW=768, T=3)
        (2, 4, 8, 16, 16, 3, 2),    # stride-2 (dense conv + subsample)
    ]
    for (N, Cin, Cout, H, W, K, s) in configs:
        key, kx, kw = jax.random.split(key, 3)
        x = jax.random.normal(kx, (N, Cin, H, W), dtype=jnp.float32)
        wt = kaiming_uniform(kw, (Cout, Cin, K, K))

        out = jax.block_until_ready(conv2d_forward(x, wt, stride=s))
        ref = conv2d_reference(x, wt, stride=s)

        assert out.shape == ref.shape, (out.shape, ref.shape)
        err = float(jnp.max(jnp.abs(out - ref)))
        assert err < 1e-4, f"max abs err {err} for config {(N, Cin, Cout, H, W, K, s)}"

    print("KERNEL_OK")
</pallas_src>

<mosaic_0001>
module attributes {stable_mosaic.version = 11 : i64} {
  func.func @_conv2d_act_kernel(%arg0: i32, %arg1: i32, %arg2: memref<1x4x512xf32, #tpu.memory_space<vmem>>, %arg3: memref<8x36xf32, #tpu.memory_space<vmem>>, %arg4: memref<1x8x256xf32, #tpu.memory_space<vmem>>, %arg5: memref<36x256xf32, #tpu.memory_space<vmem>>) attributes {dimension_semantics = [#tpu.dimension_semantics<parallel>, #tpu.dimension_semantics<parallel>], iteration_bounds = array<i64: 2, 1>, scalar_prefetch = 0 : i64, scratch_operands = 1 : i64, tpu.core_type = #tpu.core_type<tc>, window_params = [{transform_indices = @transform_0, window_bounds = array<i64: 1, 4, 512>}, {pipeline_mode = #tpu.pipeline_mode<synchronous>, transform_indices = @transform_1, window_bounds = array<i64: 8, 36>}, {transform_indices = @transform_2, window_bounds = array<i64: 1, 8, 256>}]} {
    %c256_i32 = arith.constant 256 : i32
    %0 = arith.muli %arg1, %c256_i32 : i32
    %1 = tpu.assume_multiple %0, 128 : i32
    %c0 = arith.constant 0 : index
    %c0_0 = arith.constant 0 : index
    %2 = arith.index_cast %1 : i32 to index
    %3 = vector.load %arg2[%c0, %c0_0, %2] : memref<1x4x512xf32, #tpu.memory_space<vmem>>, vector<1x4x512xf32>
    %4 = vector.shape_cast %3 : vector<1x4x512xf32> to vector<4x512xf32>
    %5 = tpu.iota {dimensions = array<i32: 1>} : vector<1x512xi32>
    %c128_i32 = arith.constant 128 : i32
    %6 = arith.subi %1, %c128_i32 : i32
    %7 = vector.broadcast %6 : i32 to vector<1x512xi32>
    %8 = arith.addi %5, %7 : vector<1x512xi32>
    %c16_i32 = arith.constant 16 : i32
    %c0_i32 = arith.constant 0 : i32
    %9 = arith.cmpi eq, %c16_i32, %c0_i32 : i32
    %c1_i32 = arith.constant 1 : i32
    %10 = arith.select %9, %c1_i32, %c16_i32 : i32
    %11 = vector.broadcast %10 : i32 to vector<1x512xi32>
    %12 = arith.remsi %8, %11 : vector<1x512xi32>
    %c0_i32_1 = arith.constant 0 : i32
    %13 = vector.broadcast %c0_i32_1 : i32 to vector<1x512xi32>
    %14 = arith.cmpi ne, %12, %13 : vector<1x512xi32>
    %c0_i32_2 = arith.constant 0 : i32
    %15 = vector.broadcast %c0_i32_2 : i32 to vector<1x512xi32>
    %16 = arith.cmpi slt, %12, %15 : vector<1x512xi32>
    %c0_i32_3 = arith.constant 0 : i32
    %17 = arith.cmpi slt, %10, %c0_i32_3 : i32
    %18 = vector.broadcast %17 : i1 to vector<1x512xi1>
    %19 = vector.broadcast %18 : vector<1x512xi1> to vector<1x512xi1>
    %20 = arith.xori %16, %19 : vector<1x512xi1>
    %21 = arith.andi %20, %14 : vector<1x512xi1>
    %22 = vector.broadcast %10 : i32 to vector<1x512xi32>
    %23 = arith.addi %12, %22 : vector<1x512xi32>
    %24 = arith.select %21, %23, %12 : vector<1x512xi1>, vector<1x512xi32>
    %c-1_i32 = arith.constant -1 : i32
    %25 = vector.broadcast %c-1_i32 : i32 to vector<1x512xi32>
    %26 = arith.subi %24, %25 : vector<1x512xi32>
    %c0_i32_4 = arith.constant 0 : i32
    %27 = vector.broadcast %c0_i32_4 : i32 to vector<1x512xi32>
    %28 = arith.cmpi sge, %26, %27 : vector<1x512xi32>
    %c-1_i32_5 = arith.constant -1 : i32
    %29 = vector.broadcast %c-1_i32_5 : i32 to vector<1x512xi32>
    %30 = arith.subi %24, %29 : vector<1x512xi32>
    %c16_i32_6 = arith.constant 16 : i32
    %31 = vector.broadcast %c16_i32_6 : i32 to vector<1x512xi32>
    %32 = arith.cmpi slt, %30, %31 : vector<1x512xi32>
    %33 = arith.andi %28, %32 : vector<1x512xi1>
    %cst = arith.constant 0.000000e+00 : f32
    %34 = vector.shape_cast %33 : vector<1x512xi1> to vector<1x512xi1>
    %35 = vector.broadcast %34 : vector<1x512xi1> to vector<4x512xi1>
    %36 = vector.broadcast %cst : f32 to vector<4x512xf32>
    %37 = arith.select %35, %4, %36 : vector<4x512xi1>, vector<4x512xf32>
    %c1_i32_7 = arith.constant 1 : i32
    %38 = vector.broadcast %c1_i32_7 : i32 to vector<1x512xi32>
    %39 = arith.subi %24, %38 : vector<1x512xi32>
    %c0_i32_8 = arith.constant 0 : i32
    %40 = vector.broadcast %c0_i32_8 : i32 to vector<1x512xi32>
    %41 = arith.cmpi sge, %39, %40 : vector<1x512xi32>
    %c1_i32_9 = arith.constant 1 : i32
    %42 = vector.broadcast %c1_i32_9 : i32 to vector<1x512xi32>
    %43 = arith.subi %24, %42 : vector<1x512xi32>
    %c16_i32_10 = arith.constant 16 : i32
    %44 = vector.broadcast %c16_i32_10 : i32 to vector<1x512xi32>
    %45 = arith.cmpi slt, %43, %44 : vector<1x512xi32>
    %46 = arith.andi %41, %45 : vector<1x512xi1>
    %cst_11 = arith.constant 0.000000e+00 : f32
    %47 = vector.shape_cast %46 : vector<1x512xi1> to vector<1x512xi1>
    %48 = vector.broadcast %47 : vector<1x512xi1> to vector<4x512xi1>
    %49 = vector.broadcast %cst_11 : f32 to vector<4x512xf32>
    %50 = arith.select %48, %4, %49 : vector<4x512xi1>, vector<4x512xf32>
    %51 = vector.extract_strided_slice %37 {offsets = [0, 111], sizes = [4, 256], strides = [1, 1]} : vector<4x512xf32> to vector<4x256xf32>
    %c0_12 = arith.constant 0 : index
    %c0_13 = arith.constant 0 : index
    %52 = vector.load %arg5[%c0_12, %c0_13] : memref<36x256xf32, #tpu.memory_space<vmem>>, vector<4x256xf32>
    tpu.vector_store %arg5[%c0_12, %c0_13], %51 {strides = array<i32>} : memref<36x256xf32, #tpu.memory_space<vmem>>, vector<4x256xf32>,
    %53 = vector.extract_strided_slice %4 {offsets = [0, 112], sizes = [4, 256], strides = [1, 1]} : vector<4x512xf32> to vector<4x256xf32>
    %c4 = arith.constant 4 : index
    %c0_14 = arith.constant 0 : index
    %54 = vector.load %arg5[%c4, %c0_14] : memref<36x256xf32, #tpu.memory_space<vmem>>, vector<4x256xf32>
    tpu.vector_store %arg5[%c4, %c0_14], %53 {strides = array<i32>} : memref<36x256xf32, #tpu.memory_space<vmem>>, vector<4x256xf32>,
    %55 = vector.extract_strided_slice %50 {offsets = [0, 113], sizes = [4, 256], strides = [1, 1]} : vector<4x512xf32> to vector<4x256xf32>
    %c8 = arith.constant 8 : index
    %c0_15 = arith.constant 0 : index
    %56 = vector.load %arg5[%c8, %c0_15] : memref<36x256xf32, #tpu.memory_space<vmem>>, vector<4x256xf32>
    tpu.vector_store %arg5[%c8, %c0_15], %55 {strides = array<i32>} : memref<36x256xf32, #tpu.memory_space<vmem>>, vector<4x256xf32>,
    %57 = vector.extract_strided_slice %37 {offsets = [0, 127], sizes = [4, 256], strides = [1, 1]} : vector<4x512xf32> to vector<4x256xf32>
    %c12 = arith.constant 12 : index
    %c0_16 = arith.constant 0 : index
    %58 = vector.load %arg5[%c12, %c0_16] : memref<36x256xf32, #tpu.memory_space<vmem>>, vector<4x256xf32>
    tpu.vector_store %arg5[%c12, %c0_16], %57 {strides = array<i32>} : memref<36x256xf32, #tpu.memory_space<vmem>>, vector<4x256xf32>,
    %59 = vector.extract_strided_slice %4 {offsets = [0, 128], sizes = [4, 256], strides = [1, 1]} : vector<4x512xf32> to vector<4x256xf32>
    %c16 = arith.constant 16 : index
    %c0_17 = arith.constant 0 : index
    %60 = vector.load %arg5[%c16, %c0_17] : memref<36x256xf32, #tpu.memory_space<vmem>>, vector<4x256xf32>
    tpu.vector_store %arg5[%c16, %c0_17], %59 {strides = array<i32>} : memref<36x256xf32, #tpu.memory_space<vmem>>, vector<4x256xf32>,
    %61 = vector.extract_strided_slice %50 {offsets = [0, 129], sizes = [4, 256], strides = [1, 1]} : vector<4x512xf32> to vector<4x256xf32>
    %c20 = arith.constant 20 : index
    %c0_18 = arith.constant 0 : index
    %62 = vector.load %arg5[%c20, %c0_18] : memref<36x256xf32, #tpu.memory_space<vmem>>, vector<4x256xf32>
    tpu.vector_store %arg5[%c20, %c0_18], %61 {strides = array<i32>} : memref<36x256xf32, #tpu.memory_space<vmem>>, vector<4x256xf32>,
    %63 = vector.extract_strided_slice %37 {offsets = [0, 143], sizes = [4, 256], strides = [1, 1]} : vector<4x512xf32> to vector<4x256xf32>
    %c24 = arith.constant 24 : index
    %c0_19 = arith.constant 0 : index
    %64 = vector.load %arg5[%c24, %c0_19] : memref<36x256xf32, #tpu.memory_space<vmem>>, vector<4x256xf32>
    tpu.vector_store %arg5[%c24, %c0_19], %63 {strides = array<i32>} : memref<36x256xf32, #tpu.memory_space<vmem>>, vector<4x256xf32>,
    %65 = vector.extract_strided_slice %4 {offsets = [0, 144], sizes = [4, 256], strides = [1, 1]} : vector<4x512xf32> to vector<4x256xf32>
    %c28 = arith.constant 28 : index
    %c0_20 = arith.constant 0 : index
    %66 = vector.load %arg5[%c28, %c0_20] : memref<36x256xf32, #tpu.memory_space<vmem>>, vector<4x256xf32>
    tpu.vector_store %arg5[%c28, %c0_20], %65 {strides = array<i32>} : memref<36x256xf32, #tpu.memory_space<vmem>>, vector<4x256xf32>,
    %67 = vector.extract_strided_slice %50 {offsets = [0, 145], sizes = [4, 256], strides = [1, 1]} : vector<4x512xf32> to vector<4x256xf32>
    %c32 = arith.constant 32 : index
    %c0_21 = arith.constant 0 : index
    %68 = vector.load %arg5[%c32, %c0_21] : memref<36x256xf32, #tpu.memory_space<vmem>>, vector<4x256xf32>
    tpu.vector_store %arg5[%c32, %c0_21], %67 {strides = array<i32>} : memref<36x256xf32, #tpu.memory_space<vmem>>, vector<4x256xf32>,
    %c0_22 = arith.constant 0 : index
    %c0_23 = arith.constant 0 : index
    %69 = vector.load %arg3[%c0_22, %c0_23] : memref<8x36xf32, #tpu.memory_space<vmem>>, vector<8x36xf32>
    %c0_24 = arith.constant 0 : index
    %c0_25 = arith.constant 0 : index
    %70 = vector.load %arg5[%c0_24, %c0_25] : memref<36x256xf32, #tpu.memory_space<vmem>>, vector<36x256xf32>
    %cst_26 = arith.constant dense<0.000000e+00> : vector<8x256xf32>
    %71 = tpu.matmul %69, %70, %cst_26 {dimension_numbers = #tpu.dot_dimension_numbers<[1], [0], [0], [1], [0, 0, 1, 1], [], []>} : vector<8x36xf32>, vector<36x256xf32>, vector<8x256xf32> -> vector<8x256xf32>
    %cst_27 = arith.constant 1.000000e-01 : f32
    %72 = vector.broadcast %cst_27 : f32 to vector<8x256xf32>
    %73 = arith.mulf %72, %71 : vector<8x256xf32>
    %74 = arith.maximumf %71, %73 : vector<8x256xf32>
    %c0_28 = arith.constant 0 : index
    %c0_29 = arith.constant 0 : index
    %c0_30 = arith.constant 0 : index
    %75 = vector.load %arg4[%c0_28, %c0_29, %c0_30] : memref<1x8x256xf32, #tpu.memory_space<vmem>>, vector<1x8x256xf32>
    %76 = vector.shape_cast %75 : vector<1x8x256xf32> to vector<8x256xf32>
    %77 = vector.shape_cast %74 : vector<8x256xf32> to vector<1x8x256xf32>
    tpu.vector_store %arg4[%c0_28, %c0_29, %c0_30], %77 {strides = array<i32>} : memref<1x8x256xf32, #tpu.memory_space<vmem>>, vector<1x8x256xf32>,
    return
  }
  func.func @transform_0(%arg0: i32, %arg1: i32) -> (i32, i32, i32) {
    %c0_i32 = arith.constant 0 : i32
    %c0_i32_0 = arith.constant 0 : i32
    %c0_i32_1 = arith.constant 0 : i32
    return %arg0, %c0_i32, %c0_i32_0 : i32, i32, i32
  }
  func.func @transform_1(%arg0: i32, %arg1: i32) -> (i32, i32) {
    %c0_i32 = arith.constant 0 : i32
    %c0_i32_0 = arith.constant 0 : i32
    %c0_i32_1 = arith.constant 0 : i32
    return %c0_i32, %c0_i32_0 : i32, i32
  }
  func.func @transform_2(%arg0: i32, %arg1: i32) -> (i32, i32, i32) {
    %c0_i32 = arith.constant 0 : i32
    %c0_i32_0 = arith.constant 0 : i32
    return %arg0, %c0_i32, %arg1 : i32, i32, i32
  }
}

</mosaic_0001>

<bundles_post_ra>
// kernel: tpu_custom_call.1
= control target key start
LH: loop header
LB: loop body
LE: loop exit
PB: predicated region body
PF: predicated region fallthrough
CT: control target
= control target key end

     0   :  { %7 = vsyncpa [#allocation4], 0  ;;  %s1205_s0 = inlined_call_operand.hbm [shape: f32[2,4,512], index: 0, kind: input, shape index: {}]   ;;  %s1206_s1 = inlined_call_operand.hbm [shape: f32[8,36], index: 1, kind: input, shape index: {}]   ;;  %s1207_s2 = inlined_call_operand.hbm [shape: f32[2,8,256], index: 2, kind: output, shape index: {}]  }
   0x1   :  { %9 = vsyncpa [#allocation4 + $0x1], 0 }
   0x2   :  { %10 = vsyncpa [#allocation7], 0 }
   0x3   :  { %11 = vsyncpa [#allocation5], 0 }
   0x4   :  { %13 = vsyncpa [#allocation5 + $0x1], 0  ;;  %s944_s9 = smov 0   ;;  %s946_s10 = smov 0  }
   0x5   :  { %s948_s11 = smov 0   ;;  %s950_s12 = smov 0  }
   0x6   :  { %s952_s13 = smov 0   ;;  %s954_s14 = smov 0  }
   0x7 LB: > { %s647_s15 = sadd.s32 4294967295, %s915_s14   ;;  %s648_s16 = sadd.s32 4294967294, %s915_s14   ;;  %s915_s14 = sphi %s954_s14, %s19_s14   ;;  %s911_s13 = sphi %s952_s13, %s1232_s13   ;;  %s907_s12 = sphi %s950_s12, %s1231_s12   ;;  %s903_s11 = sphi %s948_s11, %s1230_s11   ;;  %s899_s10 = sphi %s946_s10, %s1229_s10   ;;  %s895_s9 = sphi %s944_s9, %s1228_s9  }
   0x8   : > { %p51_p0 = scmp.ne.s32.totalorder %s899_s10, %s895_s9  ;;  %p978_p1 = scmp.eq.s32.totalorder %s647_s15, 0 }
   0x9   : > { %p982_p2 = scmp.eq.s32.totalorder %s647_s15, 1  ;;  %p104_p3 = scmp.eq.s32.totalorder %s648_s16, 1 }
   0xa   : > { %s1212_s17 = scalar_select %p978_p1, 1, 0 }
   0xb   : > { %s1213_s18 = scalar_select %p982_p2, 1, 0 }
   0xc   : > { %p988_p4 = por %p978_p1, %p51_p0  ;;  %p649_p5 = scmp.ge.s32.totalorder %s915_s14, 1 }
   0xd   : > { %p993_p6 = por %p104_p3, %p51_p0  ;;  %p111_p7 = scmp.lt.s32.totalorder %s915_s14, 3 }
   0xe   : > { %s1214_s19 = scalar_select %p988_p4, 1, 0 }
   0xf   : > { %s1215_s20 = scalar_select %p993_p6, 1, 0 }
  0x10   : > { %p998_p8 = pnand %p649_p5, %p111_p7  ;;  %s917_s22 = smov [#allocation6]  }
  0x11   : > { %s124_s23 = sshll.u32 %s917_s22, 4  ;;  %s31_s25 = sadd.s32 1, %s911_s13  ;;  %s125_s23 = int_to_ptr.vmem [resolvable:$true] %s124_s23 }
  0x12   : > { %s1216_s21 = scalar_select %p998_p8, 1, 0 }
  0x13   : > { %p693_p10 = pneg %p998_p8  ;;  %s38_s26 = sadd.s32 1, %s903_s11 }
  0x14   : > { %p1013_p12 = scmp.ge.s32.totalorder %s31_s25, 2  ;;  %s771_s30 = scalar_lea.hbm %s1206_s1, 128 }
  0x15   : > { %p1007_p11 = pnand %p693_p10, %p978_p1  ;;  %p772_p13 = scmp.ne.s32.totalorder %s1206_s1, %s771_s30 }
  0x16   : > { %s1218_s27 = scalar_select %p1013_p12, 1, 0 }
  0x17   : > { %p773_p0 = pneg %p1007_p11  ;;  %p778_p7 = scmp.lt.u32.totalorder %s771_s30, %s1206_s1 }
  0x19   : > { %p774_p3 = pnand %p773_p0, %p772_p13 }
  0x1b   : > { %p775_p5 = pneg %p774_p3 }
  0x1d   : > { %p780_p10 = pnand %p778_p7, %p775_p5 }
  0x1f   : > { %783 = shalt.err (!%p780_p10)
}
  0x20   : > { %s784_s7 = scalar_lea.vmem %s125_s23, 128  ;;  %p792_p4 = scmp.lt.s32.totalorder %s125_s23, %s125_s23 }
  0x21   : > { %p785_p9 = scmp.ne.s32.totalorder %s125_s23, %s784_s7  ;;  %p793_p8 = scmp.lt.s32.totalorder %s784_s7, %s784_s7 }
  0x23   : > { %p787_p6 = pnand %p785_p9, %p773_p0  ;;  %p794_p2 = por %p793_p8, %p792_p4 }
  0x25   : > { %p788_p1 = pneg %p787_p6 }
  0x27   : > { %p795_p12 = pnand %p794_p2, %p788_p1 }
  0x29   : > { %798 = shalt.err (!%p795_p12)
}
  0x2a   : > { %696 = dma.hbm_to_vmem [thread:$0]  (!%p1007_p11), %s1206_s1, 128, %s125_s23, [#allocation7]  }
  0x2b   : > { %p1219_p4 = scmp.ne.s32.totalorder %s1218_s27, 0  ;;  %p45_p1 = scmp.ne.s32.totalorder %s903_s11, %s899_s10 }
  0x2c   : > { %p46_p2 = scmp.eq.s32.totalorder %s915_s14, 0  ;;  %p706_p6 = scmp.lt.s32.totalorder %s915_s14, 2 }
  0x2d   : > { %s1234_s25 = smov (%p1219_p4, %s31_s25), 0  ;;  %p1220_p12 = scmp.ne.s32.totalorder %s1213_s18, 0 }
  0x2e   : > { %s35_s16 = ssub.s32 %s911_s13, %s1234_s25  ;;  %p47_p9 = por %p46_p2, %p45_p1 }
  0x2f   : > { %p36_p8 = scmp.eq.s32.totalorder %s35_s16, 0  ;;  %p1045_p13 = por %p1220_p12, %p45_p1 }
  0x30   : > { %s135_s24 = sand.u32 1, %s903_s11   ;;  %s675_s27 = sshll.u32 %s911_s13, 8 }
  0x31   : > { %s1053_s28 = scalar_select %p36_p8, %s903_s11, %s38_s26  }
  0x32   : > { %s652_s23 = sshll.u32 %s135_s24, 4  ;;  %s1059_s3 = scalar_lea.hbm %s1205_s0, %s675_s27 }
  0x33   : > { %s139_s18 = scalar_lea.vmem [#allocation3], %s652_s23  ;;  %p1063_p11 = pnand %p706_p6, %p47_p9 }
  0x34   : > { %s147_s4 = sshll.u32 %s139_s18, 4  ;;  %s136_s26 = scalar_lea.sflag [#allocation4], %s135_s24  ;;  %s1061_s4 = int_to_ptr.vmem [resolvable:$true] %s147_s4 }
  0x35   : > { %s799_s6 = scalar_lea.hbm %s1059_s3, 256  ;;  %p801_p3 = pneg %p1063_p11 }
  0x36   : > { %p800_p0 = scmp.ne.s32.totalorder %s1059_s3, %s799_s6  ;;  %s804_s15 = scalar_lea.hbm %s1205_s0, 512 }
  0x37   : > { %p805_p10 = scmp.lt.u32.totalorder %s1059_s3, %s1205_s0  ;;  %p806_p4 = scmp.lt.u32.totalorder %s804_s15, %s799_s6 }
  0x38   : > { %p802_p5 = pnand %p801_p3, %p800_p0  ;;  %p808_p2 = scmp.lt.u32.totalorder %s799_s6, %s1059_s3 }
  0x39   : > { %p807_p1 = por %p806_p4, %p805_p10 }
  0x3a   : > { %p803_p7 = pneg %p802_p5 }
  0x3b   : > { %p809_p6 = por %p808_p2, %p807_p1 }
  0x3d   : > { %p810_p8 = pnand %p809_p6, %p803_p7 }
  0x3f   : > { %813 = shalt.err (!%p810_p8)
}
  0x40   : > { %s814_s24 = scalar_lea.vmem %s1061_s4, 256  ;;  %s918_s27 = smov [#allocation3]  }
  0x41   : > { %p815_p9 = scmp.ne.s32.totalorder %s1061_s4, %s814_s24  ;;  %s819_s29 = sshll.u32 %s918_s27, 4  ;;  %s820_s29 = int_to_ptr.vmem [resolvable:$false] %s819_s29 }
  0x42   : > { %s821_s30 = scalar_lea.vmem %s820_s29, 512  ;;  %p822_p5 = scmp.lt.s32.totalorder %s1061_s4, %s820_s29 }
  0x43   : > { %p817_p12 = pnand %p815_p9, %p801_p3  ;;  %p823_p10 = scmp.lt.s32.totalorder %s821_s30, %s814_s24 }
  0x45   : > { %p818_p0 = pneg %p817_p12  ;;  %p824_p4 = por %p823_p10, %p822_p5 }
  0x47   : > { %p825_p1 = pnand %p824_p4, %p818_p0 }
  0x49   : > { %828 = shalt.err (!%p825_p1)
}
  0x4a   : > { %700 = dma.hbm_to_vmem [thread:$0]  (!%p1063_p11), %s1059_s3, 256, %s1061_s4, %s136_s26  }
  0x4b   : > { %p1223_p7 = scmp.ne.s32.totalorder %s1216_s21, 0 }
  0x4c   : > { %s1095_s18 = sand.u32 (!%p1223_p7), 1, %s899_s10   ;;  %p1224_p3 = scmp.ne.s32.totalorder (!%p1223_p7), %s1214_s19, 0 }
  0x4d   : > { %156 = sbr.rel (%p1223_p7) target bundleno = 505 (0x1f9), region = 28  ;;  %s656_s6 = sshll.u32 (!%p1223_p7), %s1095_s18, 4 }
  0x4e   : > { %s159_s7 = scalar_lea.sflag (!%p1223_p7), [#allocation4], %s1095_s18  ;;  %s162_s8 = scalar_lea.vmem (!%p1223_p7), [#allocation3], %s656_s6 }
  0x54   : > { %882 = dma.done.wait (%p1224_p3), %s159_s7, 256  }
  0x55   : > { %884 = vsyncadd (%p1224_p3), %s159_s7, 4294967040  ;;  %p1225_p11 = scmp.ne.s32.totalorder %s1212_s17, 0 }
  0x57   : > { %886 = dma.done.wait (%p1225_p11), [#allocation7], 128  }
  0x58   : > { %888 = vsyncadd (%p1225_p11), [#allocation7], 4294967168  ;;  %v195_v0 = vlaneseq  ;;  %v1109_v10 = vld [vmem:[%s162_s8] sm:$0xff]  ;;  %v1111_v11 = vld [vmem:[%s162_s8 + $0x8] sm:$0xff]  ;;  %s919_s19 = smov 16   ;;  %s920_s17 = smov 17  }
  0x59   : > { %336 = vrot.lane.b32.xlu1 %v1109_v10, %s919_s19  ;;  %v1117_v12 = vcombine.low %v1111_v11, %v1111_v11  ;;  %380 = vst [vmem:[#allocation2 + $0x28] sm:$0xf] %v1111_v11  ;;  %v280_v14 = vcombine.high %v1109_v10, %v1109_v10  ;;  %v332_v19 = vcombine.low %v1109_v10, %v1109_v10  ;;  %s921_s21 = smov 15   ;;  %s922_s3 = smov 1   ;;  %v927_v45 = vmov 0.0  }
  0x5a   : > { %v196_v1 = vand.u32 127, %v195_v0  ;;  %v281_v33 = vcombine.high %v1111_v11, %v1111_v11  ;;  %s923_s4 = smov 127   ;;  %s924_s5 = smov 113   ;;  %524 = vmatprep.mubr.f32.mxu0 %v927_v45 }
  0x5b   : > { %379 = vst [vmem:[#allocation2 + $0x20] sm:$0xf] %v280_v14  ;;  %s925_s26 = smov 112   ;;  %s926_s15 = smov 111  }
  0x5c   : > { %v197_v2 = vadd.s32 128, %v196_v1  ;;  %v198_v3 = vadd.s32 256, %v196_v1  ;;  %v202_v4 = vadd.s32 4294967168, %v196_v1  ;;  %v199_v5 = vadd.s32 384, %v196_v1  ;;  %s676_s16 = sshll.u32 %s907_s12, 8  ;;  %s186_s23 = scalar_lea.vmem [#allocation8], %s656_s6 }
  0x5d   : > { %338 = vrot.lane.b32.xlu1 %v1117_v12, %s919_s19  ;;  %s554_s24 = sshll.u32 %s186_s23, 4  ;;  %s1156_s30 = scalar_lea.hbm %s1207_s2, %s676_s16  ;;  %s1158_s24 = int_to_ptr.vmem [resolvable:$true] %s554_s24 }
  0x5e   : > { %v203_v6 = vadd.s32 4294967168, %v197_v2  ;;  %v204_v7 = vadd.s32 4294967168, %v198_v3  ;;  %v207_v8 = vsub.s32 0, %v202_v4  ;;  %v205_v9 = vadd.s32 4294967168, %v199_v5  ;;  %s538_s7 = scalar_lea.sflag [#allocation5], %s1095_s18  ;;  %s829_s12 = scalar_lea.vmem %s1158_s24, 256 }
  0x5f   : > { %p830_p2 = scmp.ne.s32.totalorder %s1158_s24, %s829_s12  ;;  %s928_s6 = smov [#allocation8]  }
  0x60   : > { %v217_v13 = vand.u32 15, %v203_v6  ;;  %v224_v15 = vand.u32 15, %v204_v7  ;;  %v210_v16 = vand.u32 15, %v207_v8  ;;  %v231_v17 = vand.u32 15, %v205_v9  ;;  %s833_s8 = sshll.u32 %s928_s6, 4  ;;  %s834_s8 = int_to_ptr.vmem [resolvable:$false] %s833_s8 }
  0x61   : > { %334 = vrot.lane.b32.xlu1 %v332_v19, %s919_s19  ;;  %p831_p6 = pnand %p830_p2, %p1045_p13  ;;  %s835_s19 = scalar_lea.vmem %s834_s8, 512 }
  0x62   : > { %v660_v18 = vadd.s32 1, %v217_v13  ;;  %v664_v20 = vadd.s32 4294967295, %v217_v13  ;;  %v661_v21 = vadd.s32 1, %v224_v15  ;;  %v665_v22 = vadd.s32 4294967295, %v224_v15  ;;  %p836_p9 = scmp.lt.s32.totalorder %s1158_s24, %s834_s8  ;;  %p837_p12 = scmp.lt.s32.totalorder %s835_s19, %s829_s12 }
  0x63   : > { %v211_v23 = vsub.s32 0, %v210_v16  ;;  %v666_v24 = vadd.s32 4294967295, %v231_v17  ;;  %v662_v37 = vadd.s32 1, %v231_v17  ;;  %p832_p8 = pneg %p831_p6 }
  0x64   : > { %vm259_vm0 = vcmp.ge.s32.totalorder %v660_v18, 0  ;;  %vm263_vm1 = vcmp.lt.s32.totalorder %v660_v18, 16  ;;  %vm293_vm2 = vcmp.ge.s32.totalorder %v664_v20, 0  ;;  %vm297_vm3 = vcmp.lt.s32.totalorder %v664_v20, 16  ;;  %p838_p0 = por %p837_p12, %p836_p9 }
  0x65   : > { %vm267_vm4 = vmand %vm259_vm0, %vm263_vm1  ;;  %vm260_vm5 = vcmp.ge.s32.totalorder %v661_v21, 0  ;;  %vm264_vm6 = vcmp.lt.s32.totalorder %v661_v21, 16  ;;  %vm294_vm7 = vcmp.ge.s32.totalorder %v665_v22, 0  ;;  %vm298_vm8 = vcmp.lt.s32.totalorder %v665_v22, 16 }
  0x66   : > { %v285_v25 = vsel %vm267_vm4, %v280_v14, 0.0  ;;  %vm268_vm9 = vmand %vm260_vm5, %vm264_vm6  ;;  %vm234_vm10 = vcmp.ne.s32.totalorder %v211_v23, 0  ;;  %vm238_vm11 = vcmp.lt.s32.totalorder %v211_v23, 0  ;;  %v246_v26 = vadd.s32 16, %v211_v23  ;;  %p839_p5 = pnand %p838_p0, %p832_p8 }
  0x67   : > { %321 = vrot.lane.b32.xlu0 %v285_v25, %s920_s17  ;;  %vm302_vm12 = vmand %vm294_vm7, %vm298_vm8  ;;  %v286_v27 = vsel %vm268_vm9, %v1111_v11, 0.0  ;;  %vm295_vm15 = vcmp.ge.s32.totalorder %v666_v24, 0  ;;  %vm299_vm0 = vcmp.lt.s32.totalorder %v666_v24, 16  ;;  %v364_v35 = vrot.slane %v285_v25, 4 }
  0x68   : > { %vm301_vm13 = vmand %vm293_vm2, %vm297_vm3  ;;  %v314_v28 = vsel %vm302_vm12, %v1111_v11, 0.0  ;;  %v365_v32 = vrot.slane %v286_v27, 4  ;;  %vm261_vm7 = vcmp.ge.s32.totalorder %v662_v37, 0  ;;  %vm265_vm8 = vcmp.lt.s32.totalorder %v662_v37, 16 }
  0x69   : > { %vm242_vm14 = vmand %vm238_vm11, %vm234_vm10  ;;  %354 = vrot.lane.b32.xlu1 %v314_v28, %s921_s21  ;;  %v313_v31 = vsel %vm301_vm13, %v280_v14, 0.0  ;;  %v383_v43 = vrot.slane %v314_v28, 4  ;;  %vm340_vm11 = vcmask 130048   ;;  %vm325_vm12 = vcmask 138240  }
  0x6a   : > { %v250_v29 = vsel %vm242_vm14, %v246_v26, %v211_v23  ;;  %vm303_vm2 = vmand %vm295_vm15, %vm299_vm0  ;;  %v382_v44 = vrot.slane %v313_v31, 4  ;;  %vm356_vm13 = vcmask 121856   ;;  %vm372_vm14 = vcmask 7168  }
  0x6b   : > { %323 = vrot.lane.b32.xlu0 %v286_v27, %s920_s17  ;;  %v659_v30 = vadd.s32 1, %v250_v29  ;;  %v663_v34 = vadd.s32 4294967295, %v250_v29  ;;  %v315_v39 = vsel %vm303_vm2, %v281_v33, 0.0  ;;  %vm269_vm10 = vmand %vm261_vm7, %vm265_vm8  ;;  %vm391_vm15 = vcmask 1039360  }
  0x6c   : > { %v384_v40 = vrot.slane %v315_v39, 4  ;;  %v287_v42 = vsel %vm269_vm10, %v281_v33, 0.0  ;;  %vm405_vm0 = vcmask 924672   ;;  %vm453_vm2 = vcmask 1043456  }
  0x6d   : > { %vm258_vm1 = vcmp.ge.s32.totalorder %v659_v30, 0  ;;  %vm262_vm4 = vcmp.lt.s32.totalorder %v659_v30, 16  ;;  %370 = vrot.lane.b32.xlu1 %v365_v32, %s922_s3  ;;  %vm292_vm5 = vcmp.ge.s32.totalorder %v663_v34, 0  ;;  %vm296_vm6 = vcmp.lt.s32.totalorder %v663_v34, 16 }
  0x6e   : > { %vm266_vm3 = vmand %vm258_vm1, %vm262_vm4  ;;  %vm418_vm1 = vcmask 916480   ;;  %vm431_vm4 = vcmask 908288  }
  0x6f   : > { %352 = vrot.lane.b32.xlu0 %v313_v31, %s921_s21  ;;  %v284_v36 = vsel %vm266_vm3, %v1109_v10, 0.0  ;;  %vm300_vm9 = vmand %vm292_vm5, %vm296_vm6  ;;  %vm449_vm3 = vcmask 293888  }
  0x70   : > { %v363_v38 = vrot.slane %v284_v36, 4  ;;  %v312_v41 = vsel %vm300_vm9, %v1109_v10, 0.0 }
  0x72   : > { %366 = vrot.lane.b32.xlu1 %v363_v38, %s922_s3 }
  0x73   : > { %368 = vrot.lane.b32.xlu0 %v364_v35, %s922_s3  ;;  %v438_v35 = vld [vmem:[#allocation6] sm:$0xff] }
  0x76   : > { %389 = vrot.lane.b32.xlu1 %v384_v40, %s923_s4 }
  0x77   : > { %319 = vrot.lane.b32.xlu0 %v284_v36, %s920_s17 }
  0x7a   : > { %403 = vrot.lane.b32.xlu1 %v287_v42, %s924_s5 }
  0x7b   : > { %350 = vrot.lane.b32.xlu0 %v312_v41, %s921_s21 }
  0x7e   : > { %416 = vrot.lane.b32.xlu1 %v1111_v11, %s925_s26 }
  0x7f   : > { %387 = vrot.lane.b32.xlu0 %v383_v43, %s923_s4 }
  0x82   : > { %399 = vrot.lane.b32.xlu1 %v285_v25, %s924_s5 }
  0x83   : > { %401 = vrot.lane.b32.xlu0 %v286_v27, %s924_s5 }
  0x86   : > { %427 = vrot.lane.b32.xlu1 %v314_v28, %s926_s15 }
  0x87   : > { %414 = vrot.lane.b32.xlu0 %v1117_v12, %s925_s26 }
  0x8a   : > { %425 = vrot.lane.b32.xlu1 %v313_v31, %s926_s15 }
  0x8b   : > { %385 = vrot.lane.b32.xlu0 %v382_v44, %s923_s4 }
  0x8f   : > { %412 = vrot.lane.b32.xlu0 %v1109_v10, %s925_s26 }
  0x93   : > { %429 = vrot.lane.b32.xlu0 %v315_v39, %s926_s15 }
  0xcb   : > { %v337_v46 = vpop.permute.xlu1 %336 }
  0xcf   : > { %v339_v47 = vpop.permute.xlu1 %338 }
  0xd0   : > { %v342_v48 = vsel %vm340_vm11, %v337_v46, %v339_v47 }
  0xd1   : > { %346 = vst [vmem:[#allocation2 + $0x8] sm:$0xf0] %v342_v48 }
  0xd3   : > { %v335_v50 = vpop.permute.xlu1 %334 }
  0xd4   : > { %v341_v51 = vsel %vm340_vm11, %v335_v50, %v337_v46 }
  0xd5   : > { %345 = vst [vmem:[#allocation2] sm:$0xf0] %v341_v51 }
  0xd9   : > { %v322_v49 = vpop.permute.xlu0 %321 }
  0xdb   : > { %v355_v54 = vpop.permute.xlu1 %354 }
  0xdd   : > { %v324_v52 = vpop.permute.xlu0 %323 }
  0xde   : > { %v327_v53 = vsel %vm325_vm12, %v322_v49, %v324_v52 }
  0xdf   : > { %331 = vst [vmem:[#allocation2 + $0x8] sm:$0xf] %v327_v53  ;;  %v371_v57 = vpop.permute.xlu1 %370 }
  0xe1   : > { %v353_v55 = vpop.permute.xlu0 %352 }
  0xe2   : > { %v358_v56 = vsel %vm356_vm13, %v353_v55, %v355_v54 }
  0xe3   : > { %362 = vst [vmem:[#allocation2 + $0x18] sm:$0xf] %v358_v56 }
  0xe4   : > { %v367_v60 = vpop.permute.xlu1 %366 }
  0xe5   : > { %v369_v58 = vpop.permute.xlu0 %368 }
  0xe6   : > { %v374_v59 = vsel %vm372_vm14, %v369_v58, %v371_v57  ;;  %v373_v61 = vsel %vm372_vm14, %v367_v60, %v369_v58  ;;  %v440_v4 = vld [vmem:[#allocation2 + $0x8] sm:$0xff] }
  0xe7   : > { %378 = vst [vmem:[#allocation2 + $0x18] sm:$0xf0] %v374_v59  ;;  %377 = vst [vmem:[#allocation2 + $0x10] sm:$0xf0] %v373_v61 }
  0xe8   : > { %v390_v0 = vpop.permute.xlu1 %389 }
  0xe9   : > { %v320_v62 = vpop.permute.xlu0 %319 }
  0xea   : > { %v326_v63 = vsel %vm325_vm12, %v320_v62, %v322_v49 }
  0xeb   : > { %330 = vst [vmem:[#allocation2] sm:$0xf] %v326_v63 }
  0xec   : > { %v404_v3 = vpop.permute.xlu1 %403 }
  0xed   : > { %v351_v1 = vpop.permute.xlu0 %350 }
  0xee   : > { %v357_v2 = vsel %vm356_vm13, %v351_v1, %v353_v55  ;;  %v442_v5 = vld [vmem:[#allocation2 + $0x18] sm:$0xff] }
  0xef   : > { %361 = vst [vmem:[#allocation2 + $0x10] sm:$0xf] %v357_v2  ;;  %v677_v6 = vpack.c.bf16 %v442_v5, %v440_v4 }
  0xf0   : > { %v417_v9 = vpop.permute.xlu1 %416 }
  0xf1   : > { %678 = vmatprep.subr.bf16.mxu0 %v677_v6  ;;  %v388_v7 = vpop.permute.xlu0 %387 }
  0xf2   : > { %v393_v8 = vsel %vm391_vm15, %v388_v7, %v390_v0  ;;  %v439_v13 = vld [vmem:[#allocation2] sm:$0xff] }
  0xf3   : > { %397 = vst [vmem:[#allocation2 + $0x28] sm:$0xf0] %v393_v8 }
  0xf4   : > { %v400_v12 = vpop.permute.xlu1 %399 }
  0xf5   : > { %v402_v10 = vpop.permute.xlu0 %401 }
  0xf6   : > { %v407_v11 = vsel %vm405_vm0, %v402_v10, %v404_v3  ;;  %v441_v14 = vld [vmem:[#allocation2 + $0x10] sm:$0xff]  ;;  %v406_v15 = vsel %vm405_vm0, %v400_v12, %v402_v10 }
  0xf7   : > { %411 = vst [vmem:[#allocation2 + $0x38] sm:$0xf] %v407_v11  ;;  %v679_v16 = vpack.c.bf16 %v441_v14, %v439_v13  ;;  %410 = vst [vmem:[#allocation2 + $0x30] sm:$0xf] %v406_v15 }
  0xf8   : > { %v428_v19 = vpop.permute.xlu1 %427 }
  0xf9   : > { %680 = vmatpush1.bf16.msra.mxu0 %v679_v16  ;;  %v415_v17 = vpop.permute.xlu0 %414 }
  0xfa   : > { %v420_v18 = vsel %vm418_vm1, %v415_v17, %v417_v9  ;;  %v444_v26 = vld [vmem:[#allocation2 + $0x28] sm:$0xff] }
  0xfb   : > { %424 = vst [vmem:[#allocation2 + $0x38] sm:$0xf0] %v420_v18 }
  0xfc   : > { %v426_v22 = vpop.permute.xlu1 %425 }
  0xfd   : > { %v386_v20 = vpop.permute.xlu0 %385  ;;  %v432_v23 = vsel %vm431_vm4, %v426_v22, %v428_v19 }
  0xfe   : > { %v392_v21 = vsel %vm391_vm15, %v386_v20, %v388_v7  ;;  %436 = vst [vmem:[#allocation2 + $0x40] sm:$0xf] %v432_v23 }
  0xff   : > { %396 = vst [vmem:[#allocation2 + $0x20] sm:$0xf0] %v392_v21 }
 0x101   : > { %v413_v24 = vpop.permute.xlu0 %412 }
 0x102   : > { %v419_v25 = vsel %vm418_vm1, %v413_v24, %v415_v17  ;;  %v446_v27 = vld [vmem:[#allocation2 + $0x38] sm:$0xff] }
 0x103   : > { %423 = vst [vmem:[#allocation2 + $0x30] sm:$0xf0] %v419_v25  ;;  %v681_v28 = vpack.c.bf16 %v446_v27, %v444_v26 }
 0x105   : > { %682 = vmatprep.subr.bf16.mxu0 %v681_v28  ;;  %v430_v29 = vpop.permute.xlu0 %429  ;;  %v447_v36 = vld [vmem:[#allocation2 + $0x40] sm:$0xf] }
 0x106   : > { %v433_v30 = vsel %vm431_vm4, %v428_v19, %v430_v29  ;;  %v443_v31 = vld [vmem:[#allocation2 + $0x20] sm:$0xff] }
 0x107   : > { %437 = vst [vmem:[#allocation2 + $0x48] sm:$0xf] %v433_v30 }
 0x10a   : > { %v445_v32 = vld [vmem:[#allocation2 + $0x30] sm:$0xff] }
 0x10b   : > { %v683_v33 = vpack.c.bf16 %v445_v32, %v443_v31 }
 0x10d   : > { %684 = vmatpush1.bf16.msra.mxu0 %v683_v33 }
 0x10e   : > { %v448_v34 = vld [vmem:[#allocation2 + $0x48] sm:$0xf] }
 0x10f   : > { %667 = vmatprep.subr.msk.mxu0 %vm453_vm2, %v448_v34 }
 0x111   : > { %668 = vmatpush1.msk.msra.mxu0 %vm453_vm2, %v447_v36 }
 0x112   : > { %669 = vmatmul.mubr.msk.f32.vlgmr.msra.gmra.mrb[0].mxu0 %vm449_vm3, %v438_v35 }
 0x1e5   : > { %v526_v37 = vpop.f32.mrb[0].mxu0 }
 0x1e6   : > { %v531_v38 = vmul.f32 0.1, %v526_v37  ;;  %v528_v39 = vpop.f32.mrb[1].mxu0 }
 0x1e7   : > { %v532_v40 = vmul.f32 0.1, %v528_v39 }
 0x1e8   : > { %v533_v41 = vmax.f32 %v526_v37, %v531_v38 }
 0x1e9   : > { %v534_v42 = vmax.f32 %v528_v39, %v532_v40 }
 0x1ea   : > { %535 = vst [vmem:[%s186_s23] sm:$0xff] %v533_v41 }
 0x1eb   : > { %536 = vst [vmem:[%s186_s23 + $0x8] sm:$0xff] %v534_v42 }
 0x1ec   : > { %842 = shalt.err (!%p839_p5)
}
 0x1ed   : > { %s843_s18 = scalar_lea.hbm %s1156_s30, 256  ;;  %s847_s3 = scalar_lea.hbm %s1207_s2, 512 }
 0x1ee   : > { %p844_p10 = scmp.ne.s32.totalorder %s1156_s30, %s843_s18  ;;  %p848_p7 = scmp.lt.u32.totalorder %s1156_s30, %s1207_s2 }
 0x1ef   : > { %p849_p3 = scmp.lt.u32.totalorder %s847_s3, %s843_s18  ;;  %p851_p2 = scmp.lt.u32.totalorder %s843_s18, %s1156_s30 }
 0x1f0   : > { %p845_p4 = pnand %p844_p10, %p1045_p13 }
 0x1f1   : > { %p850_p11 = por %p849_p3, %p848_p7 }
 0x1f2   : > { %p846_p1 = pneg %p845_p4 }
 0x1f3   : > { %p852_p6 = por %p851_p2, %p850_p11 }
 0x1f5   : > { %p853_p8 = pnand %p852_p6, %p846_p1 }
 0x1f7   : > { %856 = shalt.err (!%p853_p8)
}
 0x1f8   : > { %691 = dma.vmem_to_hbm [thread:$0]  (%p1045_p13), %s1158_s24, 256, %s1156_s30, %s538_s7  }
 0x1f9 PF: > { %s566_s26 = sand.u32 1, %s895_s9   ;;  %p1226_p9 = scmp.ne.s32.totalorder %s1215_s20, 0 }
 0x1fa   : > { %p1227_p12 = scmp.ge.s32.totalorder %s915_s14, 2  ;;  %s567_s15 = scalar_lea.sflag [#allocation5], %s566_s26 }
 0x1fc   : > { %p702_p0 = pnand %p1227_p12, %p1226_p9 }
 0x1fe   : > { %890 = dma.done.wait (!%p702_p0), %s567_s15, 256  }
 0x1ff   : > { %892 = vsyncadd (!%p702_p0), %s567_s15, 4294967040  ;;  %s19_s14 = sadd.s32 1, %s915_s14   ;;  %s1228_s9 = smov %s899_s10 }
 0x200   : > { %p16_p5 = scmp.ge.s32.totalorder %s19_s14, 4   ;;  %s1229_s10 = smov %s903_s11 }
 0x201   : > { %s1230_s11 = smov %s1053_s28  ;;  %s1231_s12 = smov %s911_s13 }
 0x202   : > { %s1232_s13 = smov %s1234_s25  ;;  %18 = sbr.rel (!%p16_p5) target bundleno = 7 (0x7), region = 78 }
 0x209   :  { %572 = vsyncpa [#allocation4], 1 }
 0x20a   :  { %574 = vsyncpa [#allocation4 + $0x1], 1 }
 0x20b   :  { %575 = vsyncpa [#allocation7], 1 }
 0x20c   :  { %576 = vsyncpa [#allocation5], 1 }
 0x20d   :  { %578 = vsyncpa [#allocation5 + $0x1], 1 }

</bundles_post_ra>
